<compile_context>
chip_gen: v5e
topology: v5e:2x2
jax: 0.10.0
libtpu: 0.0.40
codegen_flags: <defaults>
</compile_context>

<pallas_src>
import functools

import numpy as np
import jax
import jax.numpy as jnp
from jax.experimental import pallas as pl
from jax.experimental.pallas import tpu as pltpu

NP_NODES = 32                     # padded nodes per graph (21 -> 32 sublanes)
LANE = 128
GRAPHS_PER_A = LANE // NP_NODES   # 4 graphs covered by one 128x128 A block
GPB = 2 * GRAPHS_PER_A            # 8 graphs packed per grid block
MB = GPB * NP_NODES               # 256 rows per block (fills 256-wide MXU)
HALF = MB // 2                    # 128-row half handled by one A-matmul chain


def _round_up(x, m):
    return ((x + m - 1) // m) * m


# ---------------------------------------------------------------------------
# Pallas kernel: relu(A (X W1) + b1) -> relu(A (. W2) + b2) -> . W3 + b3
# x_ref is (256, F): two independent 128-row halves (4 graphs each), both
# multiplied by the same 128x128 block-diagonal A_hat.
# ---------------------------------------------------------------------------
def gcn_fused_kernel(a_ref, x_ref, w1_ref, b1_ref, w2_ref, b2_ref,
                     w3_ref, b3_ref, out_ref):
    a = a_ref[...]                                      # bf16 (128, 128)
    w1 = w1_ref[...]
    w2 = w2_ref[...]
    w3 = w3_ref[...]
    b1 = b1_ref[...]
    b2 = b2_ref[...]
    b3 = b3_ref[...]

    def gcn_layer(h_in, w, b):
        # h_in: bf16 (128, F). Bias is added AFTER the A multiply so padded
        # node rows (all-zero in A's columns) never contaminate real rows.
        h = jnp.dot(h_in, w, preferred_element_type=jnp.float32)
        h = jnp.dot(a, h.astype(jnp.bfloat16),
                    preferred_element_type=jnp.float32)
        return jnp.maximum(h + b, 0.0)                  # f32 VPU path

    # Two independent 128-row chains -> the LLO scheduler interleaves their
    # MXU pushes with the other chain's cast/bias/ReLU work.
    h0 = x_ref[:HALF, :]
    h1 = x_ref[HALF:, :]

    h0 = gcn_layer(h0, w1, b1)
    h1 = gcn_layer(h1, w1, b1)

    h0 = gcn_layer(h0.astype(jnp.bfloat16), w2, b2)
    h1 = gcn_layer(h1.astype(jnp.bfloat16), w2, b2)

    out_ref[:HALF, :] = (
        jnp.dot(h0.astype(jnp.bfloat16), w3, preferred_element_type=jnp.float32)
        + b3)
    out_ref[HALF:, :] = (
        jnp.dot(h1.astype(jnp.bfloat16), w3, preferred_element_type=jnp.float32)
        + b3)


# ---------------------------------------------------------------------------
# Host-side (numpy) precompute of A_hat and its block-diagonal padded form.
# ---------------------------------------------------------------------------
def build_ahat_block(edge_index, num_nodes):
    ei = np.asarray(edge_index)
    adj = np.zeros((num_nodes, num_nodes), np.float32)
    adj[ei[1], ei[0]] = 1.0                              # message: src -> dst
    adj = adj + np.eye(num_nodes, dtype=np.float32)      # self-loops
    deg = adj.sum(axis=1)
    dinv = 1.0 / np.sqrt(deg)
    ahat = adj * dinv[:, None] * dinv[None, :]           # (N, N) f32

    ahat_pad = np.zeros((NP_NODES, NP_NODES), np.float32)
    ahat_pad[:num_nodes, :num_nodes] = ahat
    a_block = np.kron(np.eye(GRAPHS_PER_A, dtype=np.float32), ahat_pad)  # 128x128
    return ahat, jnp.asarray(a_block, dtype=jnp.bfloat16)


# ---------------------------------------------------------------------------
# One-time parameter preparation (pad to lane-dense shapes + bf16 cast).
# Done ONCE at setup, never inside the per-call jitted forward.
# ---------------------------------------------------------------------------
def prepare_padded_params(params):
    w1, b1, w2, b2, w3, b3 = params
    f_in, h1 = w1.shape
    h2 = w2.shape[1]
    n_cls = w3.shape[1]
    f_pad = _round_up(f_in, LANE)
    h1_pad = _round_up(h1, LANE)
    h2_pad = _round_up(h2, LANE)
    c_pad = _round_up(n_cls, LANE)

    def pad_w(w, rows, cols):
        return jnp.pad(w, ((0, rows - w.shape[0]),
                           (0, cols - w.shape[1]))).astype(jnp.bfloat16)

    def pad_b(bvec, cols):
        return jnp.pad(bvec, (0, cols - bvec.shape[0])
                       ).astype(jnp.float32).reshape(1, cols)

    return (pad_w(w1, f_pad, h1_pad), pad_b(b1, h1_pad),
            pad_w(w2, h1_pad, h2_pad), pad_b(b2, h2_pad),
            pad_w(w3, h2_pad, c_pad), pad_b(b3, c_pad))


# ---------------------------------------------------------------------------
# Jitted forward: pad X only, run the fused kernel, slice real rows/cols back.
# ---------------------------------------------------------------------------
@functools.partial(jax.jit, static_argnames=("num_classes",))
def gesture_recognition_forward(x, a_block, padded_params, *, num_classes):
    w1_p, b1_p, w2_p, b2_p, w3_p, b3_p = padded_params
    b, n, f_in = x.shape
    f_pad = w1_p.shape[0]
    c_pad = w3_p.shape[1]
    h1_pad = w1_p.shape[1]
    h2_pad = w2_p.shape[1]

    b_pad = _round_up(b, GPB)
    num_blocks = b_pad // GPB

    # Single fused pad (batch, nodes, features) -> flatten graphs along rows.
    x_p = jnp.pad(x, ((0, b_pad - b), (0, NP_NODES - n), (0, f_pad - f_in)))
    x_p = x_p.reshape(b_pad * NP_NODES, f_pad).astype(jnp.bfloat16)

    # Advisory cost: 5 MXU matmuls per block over lane-dense 128/256 shapes.
    flops_per_block = 2 * MB * (f_pad * h1_pad        # X @ W1
                                + LANE * h1_pad       # A @ h1 (two 128-row halves)
                                + h1_pad * h2_pad     # h1 @ W2
                                + LANE * h2_pad       # A @ h2
                                + h2_pad * c_pad)     # h2 @ W3
    bytes_per_block = MB * f_pad * 2 + MB * c_pad * 4
    const_bytes = (LANE * LANE * 2                    # A_hat
                   + (f_pad * h1_pad + h1_pad * h2_pad + h2_pad * c_pad) * 2
                   + (h1_pad + h2_pad + c_pad) * 4)

    out = pl.pallas_call(
        gcn_fused_kernel,
        out_shape=jax.ShapeDtypeStruct((b_pad * NP_NODES, c_pad), jnp.float32),
        grid=(num_blocks,),
        in_specs=[
            pl.BlockSpec((LANE, LANE), lambda i: (0, 0)),      # A_hat block-diag
            pl.BlockSpec((MB, f_pad), lambda i: (i, 0)),       # X (8 graphs/step)
            pl.BlockSpec((f_pad, h1_pad), lambda i: (0, 0)),   # W1
            pl.BlockSpec((1, h1_pad), lambda i: (0, 0)),       # b1
            pl.BlockSpec((h1_pad, h2_pad), lambda i: (0, 0)),  # W2
            pl.BlockSpec((1, h2_pad), lambda i: (0, 0)),       # b2
            pl.BlockSpec((h2_pad, c_pad), lambda i: (0, 0)),   # W3
            pl.BlockSpec((1, c_pad), lambda i: (0, 0)),        # b3
        ],
        out_specs=pl.BlockSpec((MB, c_pad), lambda i: (i, 0)),
        compiler_params=pltpu.CompilerParams(
            dimension_semantics=("parallel",)),
        cost_estimate=pl.CostEstimate(
            flops=num_blocks * flops_per_block,
            transcendentals=0,
            bytes_accessed=num_blocks * bytes_per_block + const_bytes),
    )(a_block, x_p, w1_p, b1_p, w2_p, b2_p, w3_p, b3_p)

    out = out.reshape(b_pad, NP_NODES, c_pad)
    return out[:b, :n, :num_classes]


# ---------------------------------------------------------------------------
# Pure-JAX f32 reference (for correctness check)
# ---------------------------------------------------------------------------
def reference_forward(x, ahat, params):
    w1, b1, w2, b2, w3, b3 = params

    def one(xg):
        h = jnp.maximum(ahat @ (xg @ w1) + b1, 0.0)
        h = jnp.maximum(ahat @ (h @ w2) + b2, 0.0)
        return h @ w3 + b3

    return jax.vmap(one)(x)


# ---------------------------------------------------------------------------
# Deterministic parameter / input construction
# ---------------------------------------------------------------------------
def init_params(key, num_joints, num_classes):
    f_in = num_joints * 2
    k1, k2, k3, k4, k5, k6 = jax.random.split(key, 6)
    w1 = jax.random.normal(k1, (f_in, 128), jnp.float32) * (1.0 / jnp.sqrt(f_in))
    b1 = jax.random.normal(k2, (128,), jnp.float32) * 0.01
    w2 = jax.random.normal(k3, (128, 64), jnp.float32) * (1.0 / jnp.sqrt(128.0))
    b2 = jax.random.normal(k4, (64,), jnp.float32) * 0.01
    w3 = jax.random.normal(k5, (64, num_classes), jnp.float32) * (1.0 / 8.0)
    b3 = jax.random.normal(k6, (num_classes,), jnp.float32) * 0.01
    return (w1, b1, w2, b2, w3, b3)


def hand_keypoint_line(bilateral=True):
    # 21-keypoint hand skeleton (MediaPipe style), 20 bones.
    edges = [
        [0, 1], [1, 2], [2, 3], [3, 4],
        [0, 5], [5, 6], [6, 7], [7, 8],
        [0, 9], [9, 10], [10, 11], [11, 12],
        [0, 13], [13, 14], [14, 15], [15, 16],
        [0, 17], [17, 18], [18, 19], [19, 20],
    ]
    if bilateral:
        edges = edges + [[b, a] for a, b in edges]
    return np.asarray(edges, dtype=np.int32).T   # shape (2, E)


if __name__ == "__main__":
    num_joints = 21
    num_classes = 5
    batch = 8

    key = jax.random.PRNGKey(0)
    k_x, k_p = jax.random.split(key)

    # One batch of graphs; each node carries the flattened (x, y) coords of all
    # joints -> feature dim = num_joints * 2 (matches GCNConv(num_joints*2, 128)).
    x = jax.random.normal(k_x, (batch, num_joints, num_joints * 2), jnp.float32)
    edge_index = hand_keypoint_line(bilateral=True)
    ahat, a_block = build_ahat_block(edge_index, num_joints)   # host precompute
    params = init_params(k_p, num_joints, num_classes)
    padded_params = prepare_padded_params(params)              # one-time setup

    out = gesture_recognition_forward(x, a_block, padded_params,
                                      num_classes=num_classes)
    out = jax.block_until_ready(out)

    assert out.shape == (batch, num_joints, num_classes), out.shape
    assert bool(jnp.all(jnp.isfinite(out)))

    ref = reference_forward(x, jnp.asarray(ahat), params)
    assert float(jnp.max(jnp.abs(out - ref))) < 0.1, "mismatch vs f32 reference"

    print("KERNEL_OK")
</pallas_src>

<mosaic_0001>
module attributes {stable_mosaic.version = 11 : i64} {
  func.func @gcn_fused_kernel(%arg0: i32, %arg1: memref<128x128xbf16, #tpu.memory_space<vmem>>, %arg2: memref<256x128xbf16, #tpu.memory_space<vmem>>, %arg3: memref<128x128xbf16, #tpu.memory_space<vmem>>, %arg4: memref<1x128xf32, #tpu.memory_space<vmem>>, %arg5: memref<128x128xbf16, #tpu.memory_space<vmem>>, %arg6: memref<1x128xf32, #tpu.memory_space<vmem>>, %arg7: memref<128x128xbf16, #tpu.memory_space<vmem>>, %arg8: memref<1x128xf32, #tpu.memory_space<vmem>>, %arg9: memref<256x128xf32, #tpu.memory_space<vmem>>) attributes {dimension_semantics = [#tpu.dimension_semantics<parallel>], iteration_bounds = array<i64: 1>, scalar_prefetch = 0 : i64, scratch_operands = 0 : i64, tpu.core_type = #tpu.core_type<tc>, window_params = [{pipeline_mode = #tpu.pipeline_mode<synchronous>, transform_indices = @transform_0, window_bounds = array<i64: 128, 128>}, {transform_indices = @transform_1, window_bounds = array<i64: 256, 128>}, {pipeline_mode = #tpu.pipeline_mode<synchronous>, transform_indices = @transform_2, window_bounds = array<i64: 128, 128>}, {pipeline_mode = #tpu.pipeline_mode<synchronous>, transform_indices = @transform_3, window_bounds = array<i64: 1, 128>}, {pipeline_mode = #tpu.pipeline_mode<synchronous>, transform_indices = @transform_4, window_bounds = array<i64: 128, 128>}, {pipeline_mode = #tpu.pipeline_mode<synchronous>, transform_indices = @transform_5, window_bounds = array<i64: 1, 128>}, {pipeline_mode = #tpu.pipeline_mode<synchronous>, transform_indices = @transform_6, window_bounds = array<i64: 128, 128>}, {pipeline_mode = #tpu.pipeline_mode<synchronous>, transform_indices = @transform_7, window_bounds = array<i64: 1, 128>}, {transform_indices = @transform_8, window_bounds = array<i64: 256, 128>}]} {
    %c0 = arith.constant 0 : index
    %c0_0 = arith.constant 0 : index
    %0 = vector.load %arg1[%c0, %c0_0] : memref<128x128xbf16, #tpu.memory_space<vmem>>, vector<128x128xbf16>
    %c0_1 = arith.constant 0 : index
    %c0_2 = arith.constant 0 : index
    %1 = vector.load %arg3[%c0_1, %c0_2] : memref<128x128xbf16, #tpu.memory_space<vmem>>, vector<128x128xbf16>
    %c0_3 = arith.constant 0 : index
    %c0_4 = arith.constant 0 : index
    %2 = vector.load %arg5[%c0_3, %c0_4] : memref<128x128xbf16, #tpu.memory_space<vmem>>, vector<128x128xbf16>
    %c0_5 = arith.constant 0 : index
    %c0_6 = arith.constant 0 : index
    %3 = vector.load %arg7[%c0_5, %c0_6] : memref<128x128xbf16, #tpu.memory_space<vmem>>, vector<128x128xbf16>
    %c0_7 = arith.constant 0 : index
    %c0_8 = arith.constant 0 : index
    %4 = vector.load %arg4[%c0_7, %c0_8] : memref<1x128xf32, #tpu.memory_space<vmem>>, vector<1x128xf32>
    %c0_9 = arith.constant 0 : index
    %c0_10 = arith.constant 0 : index
    %5 = vector.load %arg6[%c0_9, %c0_10] : memref<1x128xf32, #tpu.memory_space<vmem>>, vector<1x128xf32>
    %c0_11 = arith.constant 0 : index
    %c0_12 = arith.constant 0 : index
    %6 = vector.load %arg8[%c0_11, %c0_12] : memref<1x128xf32, #tpu.memory_space<vmem>>, vector<1x128xf32>
    %c0_13 = arith.constant 0 : index
    %c0_14 = arith.constant 0 : index
    %7 = vector.load %arg2[%c0_13, %c0_14] : memref<256x128xbf16, #tpu.memory_space<vmem>>, vector<128x128xbf16>
    %c128 = arith.constant 128 : index
    %c0_15 = arith.constant 0 : index
    %8 = vector.load %arg2[%c128, %c0_15] : memref<256x128xbf16, #tpu.memory_space<vmem>>, vector<128x128xbf16>
    %cst = arith.constant dense<0.000000e+00> : vector<128x128xf32>
    %9 = tpu.matmul %7, %1, %cst {dimension_numbers = #tpu.dot_dimension_numbers<[1], [0], [0], [1], [0, 0, 1, 1], [], []>} : vector<128x128xbf16>, vector<128x128xbf16>, vector<128x128xf32> -> vector<128x128xf32>
    %10 = arith.truncf %9 : vector<128x128xf32> to vector<128x128xbf16>
    %cst_16 = arith.constant dense<0.000000e+00> : vector<128x128xf32>
    %11 = tpu.matmul %0, %10, %cst_16 {dimension_numbers = #tpu.dot_dimension_numbers<[1], [0], [0], [1], [0, 0, 1, 1], [], []>} : vector<128x128xbf16>, vector<128x128xbf16>, vector<128x128xf32> -> vector<128x128xf32>
    %12 = vector.broadcast %4 : vector<1x128xf32> to vector<128x128xf32>
    %13 = arith.addf %11, %12 : vector<128x128xf32>
    %cst_17 = arith.constant 0.000000e+00 : f32
    %14 = vector.broadcast %cst_17 : f32 to vector<128x128xf32>
    %15 = arith.maximumf %13, %14 : vector<128x128xf32>
    %cst_18 = arith.constant dense<0.000000e+00> : vector<128x128xf32>
    %16 = tpu.matmul %8, %1, %cst_18 {dimension_numbers = #tpu.dot_dimension_numbers<[1], [0], [0], [1], [0, 0, 1, 1], [], []>} : vector<128x128xbf16>, vector<128x128xbf16>, vector<128x128xf32> -> vector<128x128xf32>
    %17 = arith.truncf %16 : vector<128x128xf32> to vector<128x128xbf16>
    %cst_19 = arith.constant dense<0.000000e+00> : vector<128x128xf32>
    %18 = tpu.matmul %0, %17, %cst_19 {dimension_numbers = #tpu.dot_dimension_numbers<[1], [0], [0], [1], [0, 0, 1, 1], [], []>} : vector<128x128xbf16>, vector<128x128xbf16>, vector<128x128xf32> -> vector<128x128xf32>
    %19 = vector.broadcast %4 : vector<1x128xf32> to vector<128x128xf32>
    %20 = arith.addf %18, %19 : vector<128x128xf32>
    %cst_20 = arith.constant 0.000000e+00 : f32
    %21 = vector.broadcast %cst_20 : f32 to vector<128x128xf32>
    %22 = arith.maximumf %20, %21 : vector<128x128xf32>
    %23 = arith.truncf %15 : vector<128x128xf32> to vector<128x128xbf16>
    %cst_21 = arith.constant dense<0.000000e+00> : vector<128x128xf32>
    %24 = tpu.matmul %23, %2, %cst_21 {dimension_numbers = #tpu.dot_dimension_numbers<[1], [0], [0], [1], [0, 0, 1, 1], [], []>} : vector<128x128xbf16>, vector<128x128xbf16>, vector<128x128xf32> -> vector<128x128xf32>
    %25 = arith.truncf %24 : vector<128x128xf32> to vector<128x128xbf16>
    %cst_22 = arith.constant dense<0.000000e+00> : vector<128x128xf32>
    %26 = tpu.matmul %0, %25, %cst_22 {dimension_numbers = #tpu.dot_dimension_numbers<[1], [0], [0], [1], [0, 0, 1, 1], [], []>} : vector<128x128xbf16>, vector<128x128xbf16>, vector<128x128xf32> -> vector<128x128xf32>
    %27 = vector.broadcast %5 : vector<1x128xf32> to vector<128x128xf32>
    %28 = arith.addf %26, %27 : vector<128x128xf32>
    %cst_23 = arith.constant 0.000000e+00 : f32
    %29 = vector.broadcast %cst_23 : f32 to vector<128x128xf32>
    %30 = arith.maximumf %28, %29 : vector<128x128xf32>
    %31 = arith.truncf %22 : vector<128x128xf32> to vector<128x128xbf16>
    %cst_24 = arith.constant dense<0.000000e+00> : vector<128x128xf32>
    %32 = tpu.matmul %31, %2, %cst_24 {dimension_numbers = #tpu.dot_dimension_numbers<[1], [0], [0], [1], [0, 0, 1, 1], [], []>} : vector<128x128xbf16>, vector<128x128xbf16>, vector<128x128xf32> -> vector<128x128xf32>
    %33 = arith.truncf %32 : vector<128x128xf32> to vector<128x128xbf16>
    %cst_25 = arith.constant dense<0.000000e+00> : vector<128x128xf32>
    %34 = tpu.matmul %0, %33, %cst_25 {dimension_numbers = #tpu.dot_dimension_numbers<[1], [0], [0], [1], [0, 0, 1, 1], [], []>} : vector<128x128xbf16>, vector<128x128xbf16>, vector<128x128xf32> -> vector<128x128xf32>
    %35 = vector.broadcast %5 : vector<1x128xf32> to vector<128x128xf32>
    %36 = arith.addf %34, %35 : vector<128x128xf32>
    %cst_26 = arith.constant 0.000000e+00 : f32
    %37 = vector.broadcast %cst_26 : f32 to vector<128x128xf32>
    %38 = arith.maximumf %36, %37 : vector<128x128xf32>
    %39 = arith.truncf %30 : vector<128x128xf32> to vector<128x128xbf16>
    %cst_27 = arith.constant dense<0.000000e+00> : vector<128x128xf32>
    %40 = tpu.matmul %39, %3, %cst_27 {dimension_numbers = #tpu.dot_dimension_numbers<[1], [0], [0], [1], [0, 0, 1, 1], [], []>} : vector<128x128xbf16>, vector<128x128xbf16>, vector<128x128xf32> -> vector<128x128xf32>
    %41 = vector.broadcast %6 : vector<1x128xf32> to vector<128x128xf32>
    %42 = arith.addf %40, %41 : vector<128x128xf32>
    %c0_28 = arith.constant 0 : index
    %c0_29 = arith.constant 0 : index
    %43 = vector.load %arg9[%c0_28, %c0_29] : memref<256x128xf32, #tpu.memory_space<vmem>>, vector<128x128xf32>
    tpu.vector_store %arg9[%c0_28, %c0_29], %42 {strides = array<i32>} : memref<256x128xf32, #tpu.memory_space<vmem>>, vector<128x128xf32>,
    %44 = arith.truncf %38 : vector<128x128xf32> to vector<128x128xbf16>
    %cst_30 = arith.constant dense<0.000000e+00> : vector<128x128xf32>
    %45 = tpu.matmul %44, %3, %cst_30 {dimension_numbers = #tpu.dot_dimension_numbers<[1], [0], [0], [1], [0, 0, 1, 1], [], []>} : vector<128x128xbf16>, vector<128x128xbf16>, vector<128x128xf32> -> vector<128x128xf32>
    %46 = vector.broadcast %6 : vector<1x128xf32> to vector<128x128xf32>
    %47 = arith.addf %45, %46 : vector<128x128xf32>
    %c128_31 = arith.constant 128 : index
    %c0_32 = arith.constant 0 : index
    %48 = vector.load %arg9[%c128_31, %c0_32] : memref<256x128xf32, #tpu.memory_space<vmem>>, vector<128x128xf32>
    tpu.vector_store %arg9[%c128_31, %c0_32], %47 {strides = array<i32>} : memref<256x128xf32, #tpu.memory_space<vmem>>, vector<128x128xf32>,
    return
  }
  func.func @transform_0(%arg0: i32) -> (i32, i32) {
    %c0_i32 = arith.constant 0 : i32
    %c0_i32_0 = arith.constant 0 : i32
    %c0_i32_1 = arith.constant 0 : i32
    return %c0_i32, %c0_i32_0 : i32, i32
  }
  func.func @transform_1(%arg0: i32) -> (i32, i32) {
    %c0_i32 = arith.constant 0 : i32
    %c0_i32_0 = arith.constant 0 : i32
    return %arg0, %c0_i32 : i32, i32
  }
  func.func @transform_2(%arg0: i32) -> (i32, i32) {
    %c0_i32 = arith.constant 0 : i32
    %c0_i32_0 = arith.constant 0 : i32
    %c0_i32_1 = arith.constant 0 : i32
    return %c0_i32, %c0_i32_0 : i32, i32
  }
  func.func @transform_3(%arg0: i32) -> (i32, i32) {
    %c0_i32 = arith.constant 0 : i32
    %c0_i32_0 = arith.constant 0 : i32
    %c0_i32_1 = arith.constant 0 : i32
    return %c0_i32, %c0_i32_0 : i32, i32
  }
  func.func @transform_4(%arg0: i32) -> (i32, i32) {
    %c0_i32 = arith.constant 0 : i32
    %c0_i32_0 = arith.constant 0 : i32
    %c0_i32_1 = arith.constant 0 : i32
    return %c0_i32, %c0_i32_0 : i32, i32
  }
  func.func @transform_5(%arg0: i32) -> (i32, i32) {
    %c0_i32 = arith.constant 0 : i32
    %c0_i32_0 = arith.constant 0 : i32
    %c0_i32_1 = arith.constant 0 : i32
    return %c0_i32, %c0_i32_0 : i32, i32
  }
  func.func @transform_6(%arg0: i32) -> (i32, i32) {
    %c0_i32 = arith.constant 0 : i32
    %c0_i32_0 = arith.constant 0 : i32
    %c0_i32_1 = arith.constant 0 : i32
    return %c0_i32, %c0_i32_0 : i32, i32
  }
  func.func @transform_7(%arg0: i32) -> (i32, i32) {
    %c0_i32 = arith.constant 0 : i32
    %c0_i32_0 = arith.constant 0 : i32
    %c0_i32_1 = arith.constant 0 : i32
    return %c0_i32, %c0_i32_0 : i32, i32
  }
  func.func @transform_8(%arg0: i32) -> (i32, i32) {
    %c0_i32 = arith.constant 0 : i32
    %c0_i32_0 = arith.constant 0 : i32
    return %arg0, %c0_i32 : i32, i32
  }
}

</mosaic_0001>

<bundles_post_ra>
// kernel: gesture_recognition_forward.1
= control target key start
LH: loop header
LB: loop body
LE: loop exit
PB: predicated region body
PF: predicated region fallthrough
CT: control target
= control target key end

     0   :  { %s1812_s2 = inlined_call_operand.vmem [shape: bf16[128,128], index: 2, kind: input, shape index: {}]   ;;  %s1813_s1 = inlined_call_operand.vmem [shape: bf16[256,128], index: 1, kind: input, shape index: {}]   ;;  %s1814_s0 = inlined_call_operand.vmem [shape: bf16[128,128], index: 0, kind: input, shape index: {}]   ;;  %s1815_s3 = inlined_call_operand.vmem [shape: f32[1,128], index: 3, kind: input, shape index: {}]   ;;  %s1816_s4 = inlined_call_operand.vmem [shape: bf16[128,128], index: 4, kind: input, shape index: {}]   ;;  %s1817_s5 = inlined_call_operand.vmem [shape: f32[1,128], index: 5, kind: input, shape index: {}]   ;;  %s1818_s6 = inlined_call_operand.vmem [shape: bf16[128,128], index: 6, kind: input, shape index: {}]   ;;  %s1819_s7 = inlined_call_operand.vmem [shape: f32[1,128], index: 7, kind: input, shape index: {}]   ;;  %s1820_s8 = inlined_call_operand.vmem [shape: f32[256,128], index: 8, kind: output, shape index: {}]  }
   0x1   :  { %v1286_v0 = vld [vmem:[%s1812_s2 + $0x38] sm:$0xff]  ;;  %v1285_v1 = vld [vmem:[%s1812_s2 + $0x30] sm:$0xff]  ;;  %v1284_v2 = vld [vmem:[%s1812_s2 + $0x28] sm:$0xff] }
   0x2   :  { %1319 = vmatpush.bf16.msra.mxu2 %v1286_v0  ;;  %224 = vmatpush.bf16.msra.mxu0 %v1286_v0  ;;  %v1283_v3 = vld [vmem:[%s1812_s2 + $0x20] sm:$0xff]  ;;  %v1282_v4 = vld [vmem:[%s1812_s2 + $0x18] sm:$0xff]  ;;  %v1281_v5 = vld [vmem:[%s1812_s2 + $0x10] sm:$0xff] }
   0x3   :  { %v1280_v6 = vld [vmem:[%s1812_s2 + $0x8] sm:$0xff]  ;;  %v1279_v7 = vld [vmem:[%s1812_s2] sm:$0xff]  ;;  %v1309_v12 = vld [vmem:[%s1813_s1 + $0x30] sm:$0xff] }
   0x4   :  { %v1307_v8 = vld [vmem:[%s1813_s1 + $0x20] sm:$0xff]  ;;  %v1308_v10 = vld [vmem:[%s1813_s1 + $0x28] sm:$0xff]  ;;  %v1305_v13 = vld [vmem:[%s1813_s1 + $0x10] sm:$0xff] }
   0x5   :  { %v1303_v9 = vld [vmem:[%s1813_s1] sm:$0xff]  ;;  %v1304_v11 = vld [vmem:[%s1813_s1 + $0x8] sm:$0xff]  ;;  %v1310_v14 = vld [vmem:[%s1813_s1 + $0x38] sm:$0xff] }
   0x6   :  { %1320 = vmatpush.bf16.msra.mxu2 %v1285_v1  ;;  %225 = vmatpush.bf16.msra.mxu0 %v1285_v1  ;;  %v1306_v15 = vld [vmem:[%s1813_s1 + $0x18] sm:$0xff]  ;;  %v1311_v16 = vld [vmem:[%s1813_s1 + $0x40] sm:$0xff]  ;;  %v1312_v17 = vld [vmem:[%s1813_s1 + $0x48] sm:$0xff] }
   0x7   :  { %v1313_v18 = vld [vmem:[%s1813_s1 + $0x50] sm:$0xff]  ;;  %v1314_v19 = vld [vmem:[%s1813_s1 + $0x58] sm:$0xff]  ;;  %v1315_v20 = vld [vmem:[%s1813_s1 + $0x60] sm:$0xff] }
   0x8   :  { %v1316_v25 = vld [vmem:[%s1813_s1 + $0x68] sm:$0xff]  ;;  %v1317_v29 = vld [vmem:[%s1813_s1 + $0x70] sm:$0xff]  ;;  %v1318_v34 = vld [vmem:[%s1813_s1 + $0x78] sm:$0xff] }
   0x9   :  { %v1464_v51 = vld [vmem:[%s1814_s0] sm:$0xff]  ;;  %v1472_v54 = vld [vmem:[%s1814_s0 + $0x8] sm:$0xff]  ;;  %v1484_v58 = vld [vmem:[%s1814_s0 + $0x10] sm:$0xff] }
   0xa   :  { %1321 = vmatpush.bf16.msra.mxu2 %v1284_v2  ;;  %226 = vmatpush.bf16.msra.mxu0 %v1284_v2  ;;  %v1478_v57 = vld [vmem:[%s1814_s0 + $0x20] sm:$0xff]  ;;  %v1490_v61 = vld [vmem:[%s1814_s0 + $0x28] sm:$0xff]  ;;  %v1496_v62 = vld [vmem:[%s1814_s0 + $0x18] sm:$0xff] }
   0xe   :  { %1322 = vmatpush.bf16.msra.mxu2 %v1283_v3  ;;  %227 = vmatpush.bf16.msra.mxu0 %v1283_v3 }
  0x12   :  { %1323 = vmatpush.bf16.msra.mxu2 %v1282_v4  ;;  %228 = vmatpush.bf16.msra.mxu0 %v1282_v4 }
  0x16   :  { %1324 = vmatpush.bf16.msra.mxu2 %v1281_v5  ;;  %229 = vmatpush.bf16.msra.mxu0 %v1281_v5 }
  0x1a   :  { %1325 = vmatpush.bf16.msra.mxu2 %v1280_v6  ;;  %230 = vmatpush.bf16.msra.mxu0 %v1280_v6 }
  0x1e   :  { %1326 = vmatpush.bf16.msra.mxu2 %v1279_v7  ;;  %231 = vmatpush.bf16.msra.mxu0 %v1279_v7 }
  0x21   :  { %252 = vmatmul.bf16.vlgmr.msra.gmra.mxu2 %v1307_v8  ;;  %232 = vmatmul.bf16.vlgmr.msra.gmra.mxu0 %v1303_v9  ;;  %v1292_v8 = vld [vmem:[%s1816_s4 + $0x28] sm:$0xff] }
  0x22   :  { %445 = vmatpush.bf16.msrb.mxu2 %v1286_v0 }
  0x26   :  { %446 = vmatpush.bf16.msrb.mxu2 %v1285_v1  ;;  %v1502_v1 = vld [vmem:[%s1814_s0 + $0x30] sm:$0xff] }
  0x2a   :  { %447 = vmatpush.bf16.msrb.mxu2 %v1284_v2 }
  0x2e   :  { %448 = vmatpush.bf16.msrb.mxu2 %v1283_v3  ;;  %v1508_v3 = vld [vmem:[%s1814_s0 + $0x38] sm:$0xff] }
  0x31   :  { %257 = vmatmul.bf16.gmra.mxu2 %v1308_v10  ;;  %237 = vmatmul.bf16.gmra.mxu0 %v1304_v11  ;;  %v1291_v10 = vld [vmem:[%s1816_s4 + $0x20] sm:$0xff]  ;;  %v1290_v11 = vld [vmem:[%s1816_s4 + $0x18] sm:$0xff] }
  0x32   :  { %449 = vmatpush.bf16.msrb.mxu2 %v1282_v4 }
  0x36   :  { %450 = vmatpush.bf16.msrb.mxu2 %v1281_v5  ;;  %v1294_v5 = vld [vmem:[%s1816_s4 + $0x38] sm:$0xff] }
  0x37   :  { %623 = vmatpush.bf16.msrb.mxu0 %v1294_v5 }
  0x3a   :  { %451 = vmatpush.bf16.msrb.mxu2 %v1280_v6 }
  0x3e   :  { %452 = vmatpush.bf16.msrb.mxu2 %v1279_v7  ;;  %v1293_v7 = vld [vmem:[%s1816_s4 + $0x30] sm:$0xff] }
  0x3f   :  { %624 = vmatpush.bf16.msrb.mxu0 %v1293_v7 }
  0x41   :  { %262 = vmatmul.bf16.gmra.mxu2 %v1309_v12  ;;  %242 = vmatmul.bf16.gmra.mxu0 %v1305_v13 }
  0x42   :  { %756 = vmatpush.bf16.msra.mxu2 %v1294_v5 }
  0x43   :  { %625 = vmatpush.bf16.msrb.mxu0 %v1292_v8 }
  0x46   :  { %757 = vmatpush.bf16.msra.mxu2 %v1293_v7 }
  0x47   :  { %626 = vmatpush.bf16.msrb.mxu0 %v1291_v10 }
  0x4a   :  { %758 = vmatpush.bf16.msra.mxu2 %v1292_v8 }
  0x4b   :  { %627 = vmatpush.bf16.msrb.mxu0 %v1290_v11 }
  0x4e   :  { %759 = vmatpush.bf16.msra.mxu2 %v1291_v10 }
  0x51   :  { %267 = vmatmul.bf16.gmra.mxu2 %v1310_v14  ;;  %247 = vmatmul.bf16.gmra.mxu0 %v1306_v15  ;;  %v1289_v14 = vld [vmem:[%s1816_s4 + $0x10] sm:$0xff] }
  0x52   :  { %760 = vmatpush.bf16.msra.mxu2 %v1290_v11  ;;  %628 = vmatpush.bf16.msrb.mxu0 %v1289_v14 }
  0x56   :  { %761 = vmatpush.bf16.msra.mxu2 %v1289_v14 }
  0x61   :  { %453 = vmatmul.bf16.vlgmr.msrb.gmra.mxu2 %v1311_v16  ;;  %v1288_v16 = vld [vmem:[%s1816_s4 + $0x8] sm:$0xff] }
  0x62   :  { %629 = vmatpush.bf16.msrb.mxu0 %v1288_v16  ;;  %762 = vmatpush.bf16.msra.mxu2 %v1288_v16 }
  0x71   :  { %458 = vmatmul.bf16.gmra.mxu2 %v1312_v17 }
  0x81   :  { %463 = vmatmul.bf16.gmra.mxu2 %v1313_v18  ;;  %v1287_v18 = vld [vmem:[%s1816_s4] sm:$0xff] }
  0x82   :  { %630 = vmatpush.bf16.msrb.mxu0 %v1287_v18  ;;  %763 = vmatpush.bf16.msra.mxu2 %v1287_v18 }
  0x91   :  { %468 = vmatmul.bf16.gmra.mxu2 %v1314_v19 }
  0x9e   :  { %v233_v21 = vpop.f32.mrf.mxu0 }
  0xa1   :  { %473 = vmatmul.bf16.gmra.mxu2 %v1315_v20 }
  0xa4   :  { %v253_v22 = vpop.f32.mrf.mxu2 }
  0xa6   :  { %v235_v24 = vpop.f32.mrf.mxu0 }
  0xa7   :  { %v273_v50 = vpack.c.bf16 %v235_v24, %v233_v21 }
  0xac   :  { %v255_v23 = vpop.f32.mrf.mxu2 }
  0xad   :  { %v277_v44 = vpack.c.bf16 %v255_v23, %v253_v22 }
  0xae   :  { %v238_v27 = vpop.f32.mrf.mxu0 }
  0xb1   :  { %478 = vmatmul.bf16.gmra.mxu2 %v1316_v25  ;;  %v1542_v25 = vld [vmem:[%s1815_s3] ss:$0 sm:$0xff] }
  0xb4   :  { %v258_v26 = vpop.f32.mrf.mxu2 }
  0xb6   :  { %v240_v30 = vpop.f32.mrf.mxu0 }
  0xb7   :  { %v274_v48 = vpack.c.bf16 %v240_v30, %v238_v27 }
  0xbc   :  { %v260_v28 = vpop.f32.mrf.mxu2 }
  0xbd   :  { %v278_v42 = vpack.c.bf16 %v260_v28, %v258_v26 }
  0xbe   :  { %v243_v32 = vpop.f32.mrf.mxu0 }
  0xc1   :  { %483 = vmatmul.bf16.gmra.mxu2 %v1317_v29 }
  0xc4   :  { %v263_v31 = vpop.f32.mrf.mxu2 }
  0xc6   :  { %v245_v36 = vpop.f32.mrf.mxu0 }
  0xc7   :  { %v275_v47 = vpack.c.bf16 %v245_v36, %v243_v32 }
  0xcc   :  { %v265_v33 = vpop.f32.mrf.mxu2 }
  0xcd   :  { %v279_v40 = vpack.c.bf16 %v265_v33, %v263_v31 }
  0xce   :  { %v248_v39 = vpop.f32.mrf.mxu0 }
  0xd1   :  { %488 = vmatmul.bf16.gmra.mxu2 %v1318_v34 }
  0xd4   :  { %v268_v35 = vpop.f32.mrf.mxu2 }
  0xd6   :  { %v250_v43 = vpop.f32.mrf.mxu0 }
  0xd7   :  { %v276_v45 = vpack.c.bf16 %v250_v43, %v248_v39 }
  0xdc   :  { %v270_v37 = vpop.f32.mrf.mxu2 }
  0xdd   :  { %v280_v38 = vpack.c.bf16 %v270_v37, %v268_v35 }
  0xdf   :  { %332 = vmatpush.bf16.msra.mxu1 %v280_v38  ;;  %1327 = vmatpush.bf16.msra.mxu3 %v280_v38 }
  0xe3   :  { %333 = vmatpush.bf16.msra.mxu1 %v279_v40  ;;  %1328 = vmatpush.bf16.msra.mxu3 %v279_v40 }
  0xe4   :  { %v1455_v41 = vpop.f32.mrf.mxu2 }
  0xe7   :  { %334 = vmatpush.bf16.msra.mxu1 %v278_v42  ;;  %1329 = vmatpush.bf16.msra.mxu3 %v278_v42 }
  0xeb   :  { %335 = vmatpush.bf16.msra.mxu1 %v277_v44  ;;  %1330 = vmatpush.bf16.msra.mxu3 %v277_v44 }
  0xec   :  { %v1457_v46 = vpop.f32.mrf.mxu2 }
  0xed   :  { %v494_v23 = vpack.c.bf16 %v1457_v46, %v1455_v41 }
  0xef   :  { %336 = vmatpush.bf16.msra.mxu1 %v276_v45  ;;  %1331 = vmatpush.bf16.msra.mxu3 %v276_v45 }
  0xf3   :  { %337 = vmatpush.bf16.msra.mxu1 %v275_v47  ;;  %1332 = vmatpush.bf16.msra.mxu3 %v275_v47 }
  0xf4   :  { %v1459_v49 = vpop.f32.mrf.mxu2 }
  0xf7   :  { %338 = vmatpush.bf16.msra.mxu1 %v274_v48  ;;  %1333 = vmatpush.bf16.msra.mxu3 %v274_v48 }
  0xfb   :  { %339 = vmatpush.bf16.msra.mxu1 %v273_v50  ;;  %1334 = vmatpush.bf16.msra.mxu3 %v273_v50 }
  0xfc   :  { %v1466_v52 = vpop.f32.mrf.mxu2 }
  0xfd   :  { %v495_v22 = vpack.c.bf16 %v1466_v52, %v1459_v49 }
  0xfe   :  { %340 = vmatmul.bf16.vlgmr.msra.gmra.mxu1 %v1464_v51  ;;  %360 = vmatmul.bf16.vlgmr.msra.gmra.mxu3 %v1478_v57 }
 0x104   :  { %v464_v53 = vpop.f32.mrf.mxu2 }
 0x10c   :  { %v466_v55 = vpop.f32.mrf.mxu2 }
 0x10d   :  { %v496_v21 = vpack.c.bf16 %v466_v55, %v464_v53 }
 0x10e   :  { %345 = vmatmul.bf16.gmra.mxu1 %v1472_v54  ;;  %365 = vmatmul.bf16.gmra.mxu3 %v1490_v61 }
 0x114   :  { %v469_v56 = vpop.f32.mrf.mxu2 }
 0x11c   :  { %v471_v59 = vpop.f32.mrf.mxu2 }
 0x11d   :  { %v497_v20 = vpack.c.bf16 %v471_v59, %v469_v56 }
 0x11e   :  { %350 = vmatmul.bf16.gmra.mxu1 %v1484_v58  ;;  %370 = vmatmul.bf16.gmra.mxu3 %v1502_v1 }
 0x124   :  { %v474_v60 = vpop.f32.mrf.mxu2 }
 0x12c   :  { %v476_v63 = vpop.f32.mrf.mxu2 }
 0x12d   :  { %v498_v19 = vpack.c.bf16 %v476_v63, %v474_v60 }
 0x12e   :  { %355 = vmatmul.bf16.gmra.mxu1 %v1496_v62  ;;  %375 = vmatmul.bf16.gmra.mxu3 %v1508_v3 }
 0x134   :  { %v479_v0 = vpop.f32.mrf.mxu2 }
 0x13c   :  { %v481_v2 = vpop.f32.mrf.mxu2 }
 0x13d   :  { %v499_v17 = vpack.c.bf16 %v481_v2, %v479_v0 }
 0x144   :  { %v484_v4 = vpop.f32.mrf.mxu2 }
 0x14c   :  { %v486_v6 = vpop.f32.mrf.mxu2 }
 0x14d   :  { %v500_v15 = vpack.c.bf16 %v486_v6, %v484_v4 }
 0x154   :  { %v489_v9 = vpop.f32.mrf.mxu2 }
 0x15c   :  { %v491_v12 = vpop.f32.mrf.mxu2 }
 0x15d   :  { %v501_v13 = vpack.c.bf16 %v491_v12, %v489_v9 }
 0x15f   :  { %502 = vmatpush.bf16.msrb.mxu3 %v501_v13 }
 0x163   :  { %503 = vmatpush.bf16.msrb.mxu3 %v500_v15 }
 0x167   :  { %504 = vmatpush.bf16.msrb.mxu3 %v499_v17 }
 0x16b   :  { %505 = vmatpush.bf16.msrb.mxu3 %v498_v19 }
 0x16f   :  { %506 = vmatpush.bf16.msrb.mxu3 %v497_v20 }
 0x173   :  { %507 = vmatpush.bf16.msrb.mxu3 %v496_v21 }
 0x177   :  { %508 = vmatpush.bf16.msrb.mxu3 %v495_v22 }
 0x17b   :  { %v341_v24 = vpop.f32.mrf.mxu1  ;;  %509 = vmatpush.bf16.msrb.mxu3 %v494_v23 }
 0x17c   :  { %v342_v26 = vadd.f32 %v1542_v25, %v341_v24 }
 0x17e   :  { %510 = vmatmul.bf16.vlgmr.msrb.gmra.mxu3 %v1464_v51  ;;  %v381_v28 = vmax.f32 %v342_v26, 0.0 }
 0x181   :  { %v361_v45 = vpop.f32.mrf.mxu3 }
 0x182   :  { %v362_v60 = vadd.f32 %v1542_v25, %v361_v45 }
 0x183   :  { %v343_v27 = vpop.f32.mrf.mxu1 }
 0x184   :  { %v344_v29 = vadd.f32 %v1542_v25, %v343_v27  ;;  %v389_v0 = vmax.f32 %v362_v60, 0.0 }
 0x186   :  { %v382_v30 = vmax.f32 %v344_v29, 0.0 }
 0x188   :  { %v567_v31 = vpack.c.bf16 %v382_v30, %v381_v28 }
 0x189   :  { %v363_v49 = vpop.f32.mrf.mxu3 }
 0x18a   :  { %631 = vmatmul.bf16.vlgmr.msrb.gmra.mxu0 %v567_v31  ;;  %v364_v63 = vadd.f32 %v1542_v25, %v363_v49 }
 0x18b   :  { %v346_v32 = vpop.f32.mrf.mxu1 }
 0x18c   :  { %v347_v33 = vadd.f32 %v1542_v25, %v346_v32  ;;  %v390_v2 = vmax.f32 %v364_v63, 0.0 }
 0x18e   :  { %515 = vmatmul.bf16.gmra.mxu3 %v1472_v54  ;;  %v383_v35 = vmax.f32 %v347_v33, 0.0  ;;  %v571_v5 = vpack.c.bf16 %v390_v2, %v389_v0 }
 0x191   :  { %v366_v59 = vpop.f32.mrf.mxu3 }
 0x192   :  { %v367_v7 = vadd.f32 %v1542_v25, %v366_v59 }
 0x193   :  { %v348_v34 = vpop.f32.mrf.mxu1 }
 0x194   :  { %v349_v36 = vadd.f32 %v1542_v25, %v348_v34  ;;  %v391_v9 = vmax.f32 %v367_v7, 0.0 }
 0x196   :  { %v384_v37 = vmax.f32 %v349_v36, 0.0 }
 0x198   :  { %v568_v38 = vpack.c.bf16 %v384_v37, %v383_v35 }
 0x199   :  { %v368_v4 = vpop.f32.mrf.mxu3 }
 0x19a   :  { %636 = vmatmul.bf16.gmra.mxu0 %v568_v38  ;;  %v369_v8 = vadd.f32 %v1542_v25, %v368_v4 }
 0x19b   :  { %v351_v39 = vpop.f32.mrf.mxu1 }
 0x19c   :  { %v352_v40 = vadd.f32 %v1542_v25, %v351_v39  ;;  %v392_v10 = vmax.f32 %v369_v8, 0.0 }
 0x19e   :  { %520 = vmatmul.bf16.gmra.mxu3 %v1484_v58  ;;  %v385_v42 = vmax.f32 %v352_v40, 0.0  ;;  %v572_v11 = vpack.c.bf16 %v392_v10, %v391_v9 }
 0x1a1   :  { %v371_v6 = vpop.f32.mrf.mxu3 }
 0x1a2   :  { %v372_v13 = vadd.f32 %v1542_v25, %v371_v6 }
 0x1a3   :  { %v353_v41 = vpop.f32.mrf.mxu1 }
 0x1a4   :  { %v354_v43 = vadd.f32 %v1542_v25, %v353_v41  ;;  %v393_v16 = vmax.f32 %v372_v13, 0.0 }
 0x1a6   :  { %v386_v44 = vmax.f32 %v354_v43, 0.0 }
 0x1a8   :  { %v569_v46 = vpack.c.bf16 %v386_v44, %v385_v42 }
 0x1a9   :  { %v373_v12 = vpop.f32.mrf.mxu3 }
 0x1aa   :  { %641 = vmatmul.bf16.gmra.mxu0 %v569_v46  ;;  %v374_v14 = vadd.f32 %v1542_v25, %v373_v12 }
 0x1ab   :  { %v356_v47 = vpop.f32.mrf.mxu1 }
 0x1ac   :  { %v357_v48 = vadd.f32 %v1542_v25, %v356_v47  ;;  %v394_v17 = vmax.f32 %v374_v14, 0.0 }
 0x1ae   :  { %525 = vmatmul.bf16.gmra.mxu3 %v1496_v62  ;;  %v387_v52 = vmax.f32 %v357_v48, 0.0  ;;  %v573_v18 = vpack.c.bf16 %v394_v17, %v393_v16 }
 0x1b1   :  { %v376_v15 = vpop.f32.mrf.mxu3 }
 0x1b2   :  { %v377_v20 = vadd.f32 %v1542_v25, %v376_v15 }
 0x1b3   :  { %v358_v50 = vpop.f32.mrf.mxu1 }
 0x1b4   :  { %v359_v53 = vadd.f32 %v1542_v25, %v358_v50  ;;  %v395_v22 = vmax.f32 %v377_v20, 0.0 }
 0x1b6   :  { %v388_v55 = vmax.f32 %v359_v53, 0.0 }
 0x1b8   :  { %v570_v56 = vpack.c.bf16 %v388_v55, %v387_v52 }
 0x1b9   :  { %v378_v19 = vpop.f32.mrf.mxu3 }
 0x1ba   :  { %646 = vmatmul.bf16.gmra.mxu0 %v570_v56  ;;  %v379_v21 = vadd.f32 %v1542_v25, %v378_v19 }
 0x1bc   :  { %v396_v23 = vmax.f32 %v379_v21, 0.0 }
 0x1be   :  { %530 = vmatmul.bf16.gmra.mxu3 %v1478_v57  ;;  %v574_v24 = vpack.c.bf16 %v396_v23, %v395_v22 }
 0x1ca   :  { %651 = vmatmul.bf16.gmra.mxu0 %v571_v5 }
 0x1ce   :  { %535 = vmatmul.bf16.gmra.mxu3 %v1490_v61 }
 0x1da   :  { %656 = vmatmul.bf16.gmra.mxu0 %v572_v11 }
 0x1de   :  { %540 = vmatmul.bf16.gmra.mxu3 %v1502_v1 }
 0x1ea   :  { %661 = vmatmul.bf16.gmra.mxu0 %v573_v18 }
 0x1ee   :  { %545 = vmatmul.bf16.gmra.mxu3 %v1508_v3 }
 0x1fa   :  { %666 = vmatmul.bf16.gmra.mxu0 %v574_v24 }
 0x201   :  { %v511_v26 = vpop.f32.mrf.mxu3 }
 0x202   :  { %v512_v28 = vadd.f32 %v1542_v25, %v511_v26 }
 0x204   :  { %v551_v31 = vmax.f32 %v512_v28, 0.0 }
 0x207   :  { %v1568_v27 = vpop.f32.mrf.mxu0 }
 0x209   :  { %v513_v29 = vpop.f32.mrf.mxu3 }
 0x20a   :  { %v514_v30 = vadd.f32 %v1542_v25, %v513_v29 }
 0x20c   :  { %v552_v32 = vmax.f32 %v514_v30, 0.0 }
 0x20e   :  { %v748_v33 = vpack.c.bf16 %v552_v32, %v551_v31 }
 0x20f   :  { %v1572_v34 = vpop.f32.mrf.mxu0 }
 0x210   :  { %764 = vmatmul.bf16.vlgmr.msra.gmra.mxu2 %v748_v33 }
 0x211   :  { %v516_v35 = vpop.f32.mrf.mxu3 }
 0x212   :  { %v517_v37 = vadd.f32 %v1542_v25, %v516_v35 }
 0x214   :  { %v553_v40 = vmax.f32 %v517_v37, 0.0 }
 0x217   :  { %v1574_v36 = vpop.f32.mrf.mxu0 }
 0x219   :  { %v518_v38 = vpop.f32.mrf.mxu3 }
 0x21a   :  { %v519_v39 = vadd.f32 %v1542_v25, %v518_v38 }
 0x21c   :  { %v554_v41 = vmax.f32 %v519_v39, 0.0 }
 0x21e   :  { %v749_v42 = vpack.c.bf16 %v554_v41, %v553_v40 }
 0x21f   :  { %v1578_v43 = vpop.f32.mrf.mxu0 }
 0x220   :  { %769 = vmatmul.bf16.gmra.mxu2 %v749_v42 }
 0x221   :  { %v521_v44 = vpop.f32.mrf.mxu3 }
 0x222   :  { %v522_v46 = vadd.f32 %v1542_v25, %v521_v44 }
 0x224   :  { %v555_v49 = vmax.f32 %v522_v46, 0.0 }
 0x227   :  { %v1580_v45 = vpop.f32.mrf.mxu0 }
 0x229   :  { %v523_v47 = vpop.f32.mrf.mxu3 }
 0x22a   :  { %v524_v48 = vadd.f32 %v1542_v25, %v523_v47 }
 0x22c   :  { %v556_v50 = vmax.f32 %v524_v48, 0.0 }
 0x22e   :  { %v750_v52 = vpack.c.bf16 %v556_v50, %v555_v49 }
 0x22f   :  { %v1584_v53 = vpop.f32.mrf.mxu0 }
 0x230   :  { %774 = vmatmul.bf16.gmra.mxu2 %v750_v52 }
 0x231   :  { %v526_v55 = vpop.f32.mrf.mxu3 }
 0x232   :  { %v527_v59 = vadd.f32 %v1542_v25, %v526_v55 }
 0x234   :  { %v557_v0 = vmax.f32 %v527_v59, 0.0  ;;  %v674_v59 = vpack.c.bf16 %v1584_v53, %v1580_v45 }
 0x237   :  { %v647_v56 = vpop.f32.mrf.mxu0 }
 0x239   :  { %v528_v60 = vpop.f32.mrf.mxu3 }
 0x23a   :  { %v529_v63 = vadd.f32 %v1542_v25, %v528_v60 }
 0x23c   :  { %v558_v2 = vmax.f32 %v529_v63, 0.0 }
 0x23e   :  { %v751_v4 = vpack.c.bf16 %v558_v2, %v557_v0  ;;  %v672_v2 = vpack.c.bf16 %v1572_v34, %v1568_v27 }
 0x23f   :  { %v649_v5 = vpop.f32.mrf.mxu0 }
 0x240   :  { %779 = vmatmul.bf16.gmra.mxu2 %v751_v4  ;;  %v675_v55 = vpack.c.bf16 %v649_v5, %v647_v56 }
 0x241   :  { %v531_v6 = vpop.f32.mrf.mxu3 }
 0x242   :  { %v532_v8 = vadd.f32 %v1542_v25, %v531_v6 }
 0x244   :  { %v559_v11 = vmax.f32 %v532_v8, 0.0 }
 0x247   :  { %v652_v7 = vpop.f32.mrf.mxu0 }
 0x249   :  { %v533_v9 = vpop.f32.mrf.mxu3 }
 0x24a   :  { %v534_v10 = vadd.f32 %v1542_v25, %v533_v9 }
 0x24c   :  { %v560_v12 = vmax.f32 %v534_v10, 0.0 }
 0x24e   :  { %v752_v13 = vpack.c.bf16 %v560_v12, %v559_v11 }
 0x24f   :  { %v654_v14 = vpop.f32.mrf.mxu0 }
 0x250   :  { %784 = vmatmul.bf16.gmra.mxu2 %v752_v13  ;;  %v676_v52 = vpack.c.bf16 %v654_v14, %v652_v7 }
 0x251   :  { %v536_v15 = vpop.f32.mrf.mxu3 }
 0x252   :  { %v537_v17 = vadd.f32 %v1542_v25, %v536_v15 }
 0x254   :  { %v561_v20 = vmax.f32 %v537_v17, 0.0 }
 0x257   :  { %v657_v16 = vpop.f32.mrf.mxu0 }
 0x259   :  { %v538_v18 = vpop.f32.mrf.mxu3 }
 0x25a   :  { %v539_v19 = vadd.f32 %v1542_v25, %v538_v18  ;;  %v1302_v18 = vld [vmem:[%s1818_s6 + $0x38] sm:$0xff] }
 0x25b   :  { %937 = vmatpush.bf16.msra.mxu0 %v1302_v18 }
 0x25c   :  { %v562_v21 = vmax.f32 %v539_v19, 0.0  ;;  %v1301_v19 = vld [vmem:[%s1818_s6 + $0x30] sm:$0xff] }
 0x25e   :  { %v753_v22 = vpack.c.bf16 %v562_v21, %v561_v20  ;;  %v1296_v21 = vld [vmem:[%s1818_s6 + $0x8] sm:$0xff] }
 0x25f   :  { %v659_v23 = vpop.f32.mrf.mxu0  ;;  %938 = vmatpush.bf16.msra.mxu0 %v1301_v19 }
 0x260   :  { %789 = vmatmul.bf16.gmra.mxu2 %v753_v22  ;;  %v677_v50 = vpack.c.bf16 %v659_v23, %v657_v16 }
 0x261   :  { %v541_v24 = vpop.f32.mrf.mxu3 }
 0x262   :  { %v542_v28 = vadd.f32 %v1542_v25, %v541_v24 }
 0x264   :  { %v563_v31 = vmax.f32 %v542_v28, 0.0 }
 0x267   :  { %v662_v26 = vpop.f32.mrf.mxu0 }
 0x269   :  { %v543_v29 = vpop.f32.mrf.mxu3 }
 0x26a   :  { %v544_v30 = vadd.f32 %v1542_v25, %v543_v29 }
 0x26c   :  { %v564_v32 = vmax.f32 %v544_v30, 0.0 }
 0x26e   :  { %v754_v33 = vpack.c.bf16 %v564_v32, %v563_v31 }
 0x26f   :  { %v664_v35 = vpop.f32.mrf.mxu0 }
 0x270   :  { %794 = vmatmul.bf16.gmra.mxu2 %v754_v33  ;;  %v678_v49 = vpack.c.bf16 %v664_v35, %v662_v26  ;;  %v1295_v26 = vld [vmem:[%s1818_s6] sm:$0xff] }
 0x271   :  { %v546_v37 = vpop.f32.mrf.mxu3 }
 0x272   :  { %v547_v39 = vadd.f32 %v1542_v25, %v546_v37 }
 0x274   :  { %v565_v42 = vmax.f32 %v547_v39, 0.0 }
 0x277   :  { %v667_v38 = vpop.f32.mrf.mxu0 }
 0x279   :  { %v548_v40 = vpop.f32.mrf.mxu3 }
 0x27a   :  { %v549_v41 = vadd.f32 %v1542_v25, %v548_v40  ;;  %v673_v25 = vpack.c.bf16 %v1578_v43, %v1574_v36 }
 0x27c   :  { %v566_v44 = vmax.f32 %v549_v41, 0.0 }
 0x27e   :  { %v755_v46 = vpack.c.bf16 %v566_v44, %v565_v42 }
 0x27f   :  { %v669_v47 = vpop.f32.mrf.mxu0 }
 0x280   :  { %v679_v48 = vpack.c.bf16 %v669_v47, %v667_v38  ;;  %799 = vmatmul.bf16.gmra.mxu2 %v755_v46 }
 0x282   :  { %683 = vmatpush.bf16.msrb.mxu1 %v679_v48 }
 0x286   :  { %684 = vmatpush.bf16.msrb.mxu1 %v678_v49 }
 0x28a   :  { %685 = vmatpush.bf16.msrb.mxu1 %v677_v50 }
 0x28e   :  { %686 = vmatpush.bf16.msrb.mxu1 %v676_v52 }
 0x292   :  { %687 = vmatpush.bf16.msrb.mxu1 %v675_v55 }
 0x293   :  { %v765_v60 = vpop.f32.mrf.mxu2 }
 0x296   :  { %688 = vmatpush.bf16.msrb.mxu1 %v674_v59 }
 0x29a   :  { %689 = vmatpush.bf16.msrb.mxu1 %v673_v25 }
 0x29b   :  { %v767_v63 = vpop.f32.mrf.mxu2 }
 0x29c   :  { %v805_v0 = vpack.c.bf16 %v767_v63, %v765_v60 }
 0x29e   :  { %690 = vmatpush.bf16.msrb.mxu1 %v672_v2 }
 0x2a1   :  { %691 = vmatmul.bf16.vlgmr.msrb.gmra.mxu1 %v1464_v51 }
 0x2a2   :  { %1010 = vmatpush.bf16.msra.mxu1 %v1302_v18 }
 0x2a3   :  { %v770_v4 = vpop.f32.mrf.mxu2 }
 0x2a6   :  { %1011 = vmatpush.bf16.msra.mxu1 %v1301_v19 }
 0x2ab   :  { %v772_v56 = vpop.f32.mrf.mxu2 }
 0x2ac   :  { %v806_v5 = vpack.c.bf16 %v772_v56, %v770_v4 }
 0x2b1   :  { %696 = vmatmul.bf16.gmra.mxu1 %v1472_v54 }
 0x2b3   :  { %v775_v45 = vpop.f32.mrf.mxu2 }
 0x2bb   :  { %v777_v53 = vpop.f32.mrf.mxu2 }
 0x2bc   :  { %v807_v6 = vpack.c.bf16 %v777_v53, %v775_v45 }
 0x2c1   :  { %701 = vmatmul.bf16.gmra.mxu1 %v1484_v58 }
 0x2c3   :  { %v780_v36 = vpop.f32.mrf.mxu2 }
 0x2cb   :  { %v782_v43 = vpop.f32.mrf.mxu2 }
 0x2cc   :  { %v808_v7 = vpack.c.bf16 %v782_v43, %v780_v36 }
 0x2d1   :  { %706 = vmatmul.bf16.gmra.mxu1 %v1496_v62 }
 0x2d3   :  { %v785_v8 = vpop.f32.mrf.mxu2 }
 0x2db   :  { %v787_v27 = vpop.f32.mrf.mxu2 }
 0x2dc   :  { %v809_v17 = vpack.c.bf16 %v787_v27, %v785_v8 }
 0x2e1   :  { %711 = vmatmul.bf16.gmra.mxu1 %v1478_v57 }
 0x2e3   :  { %v790_v34 = vpop.f32.mrf.mxu2 }
 0x2eb   :  { %v792_v9 = vpop.f32.mrf.mxu2 }
 0x2ec   :  { %v810_v16 = vpack.c.bf16 %v792_v9, %v790_v34 }
 0x2f1   :  { %716 = vmatmul.bf16.gmra.mxu1 %v1490_v61 }
 0x2f3   :  { %v795_v10 = vpop.f32.mrf.mxu2 }
 0x2fb   :  { %v797_v11 = vpop.f32.mrf.mxu2 }
 0x2fc   :  { %v811_v15 = vpack.c.bf16 %v797_v11, %v795_v10 }
 0x301   :  { %721 = vmatmul.bf16.gmra.mxu1 %v1502_v1 }
 0x303   :  { %v800_v12 = vpop.f32.mrf.mxu2 }
 0x30b   :  { %v802_v13 = vpop.f32.mrf.mxu2 }
 0x30c   :  { %v812_v14 = vpack.c.bf16 %v802_v13, %v800_v12 }
 0x30e   :  { %813 = vmatpush.bf16.msra.mxu3 %v812_v14 }
 0x311   :  { %726 = vmatmul.bf16.gmra.mxu1 %v1508_v3 }
 0x312   :  { %814 = vmatpush.bf16.msra.mxu3 %v811_v15 }
 0x316   :  { %815 = vmatpush.bf16.msra.mxu3 %v810_v16 }
 0x31a   :  { %816 = vmatpush.bf16.msra.mxu3 %v809_v17 }
 0x31e   :  { %817 = vmatpush.bf16.msra.mxu3 %v808_v7  ;;  %v692_v20 = vpop.f32.mrf.mxu1 }
 0x322   :  { %818 = vmatpush.bf16.msra.mxu3 %v807_v6 }
 0x326   :  { %819 = vmatpush.bf16.msra.mxu3 %v806_v5  ;;  %v694_v22 = vpop.f32.mrf.mxu1 }
 0x32a   :  { %820 = vmatpush.bf16.msra.mxu3 %v805_v0 }
 0x32d   :  { %821 = vmatmul.bf16.vlgmr.msra.gmra.mxu3 %v1464_v51  ;;  %v1300_v51 = vld [vmem:[%s1818_s6 + $0x28] sm:$0xff] }
 0x32e   :  { %939 = vmatpush.bf16.msra.mxu0 %v1300_v51  ;;  %1012 = vmatpush.bf16.msra.mxu1 %v1300_v51  ;;  %v697_v30 = vpop.f32.mrf.mxu1 }
 0x336   :  { %v699_v31 = vpop.f32.mrf.mxu1 }
 0x33d   :  { %826 = vmatmul.bf16.gmra.mxu3 %v1472_v54  ;;  %v1299_v54 = vld [vmem:[%s1818_s6 + $0x20] sm:$0xff] }
 0x33e   :  { %940 = vmatpush.bf16.msra.mxu0 %v1299_v54  ;;  %1013 = vmatpush.bf16.msra.mxu1 %v1299_v54  ;;  %v702_v39 = vpop.f32.mrf.mxu1 }
 0x346   :  { %v704_v40 = vpop.f32.mrf.mxu1 }
 0x34d   :  { %831 = vmatmul.bf16.gmra.mxu3 %v1484_v58  ;;  %v1298_v58 = vld [vmem:[%s1818_s6 + $0x18] sm:$0xff] }
 0x34e   :  { %941 = vmatpush.bf16.msra.mxu0 %v1298_v58  ;;  %1014 = vmatpush.bf16.msra.mxu1 %v1298_v58  ;;  %v707_v48 = vpop.f32.mrf.mxu1 }
 0x356   :  { %v709_v52 = vpop.f32.mrf.mxu1 }
 0x35d   :  { %836 = vmatmul.bf16.gmra.mxu3 %v1496_v62  ;;  %v1297_v62 = vld [vmem:[%s1818_s6 + $0x10] sm:$0xff] }
 0x35e   :  { %942 = vmatpush.bf16.msra.mxu0 %v1297_v62  ;;  %1015 = vmatpush.bf16.msra.mxu1 %v1297_v62  ;;  %v712_v5 = vpop.f32.mrf.mxu1 }
 0x362   :  { %943 = vmatpush.bf16.msra.mxu0 %v1296_v21  ;;  %1016 = vmatpush.bf16.msra.mxu1 %v1296_v21 }
 0x366   :  { %944 = vmatpush.bf16.msra.mxu0 %v1295_v26  ;;  %1017 = vmatpush.bf16.msra.mxu1 %v1295_v26  ;;  %v714_v6 = vpop.f32.mrf.mxu1 }
 0x36d   :  { %841 = vmatmul.bf16.gmra.mxu3 %v1478_v57  ;;  %v1640_v57 = vld [vmem:[%s1817_s5] ss:$0 sm:$0xff] }
 0x36e   :  { %v695_v24 = vadd.f32 %v1640_v57, %v694_v22  ;;  %v698_v32 = vadd.f32 %v1640_v57, %v697_v30  ;;  %v700_v33 = vadd.f32 %v1640_v57, %v699_v31  ;;  %v703_v41 = vadd.f32 %v1640_v57, %v702_v39  ;;  %v717_v13 = vpop.f32.mrf.mxu1 }
 0x36f   :  { %v708_v55 = vadd.f32 %v1640_v57, %v707_v48  ;;  %v710_v59 = vadd.f32 %v1640_v57, %v709_v52  ;;  %v713_v43 = vadd.f32 %v1640_v57, %v712_v5  ;;  %v715_v7 = vadd.f32 %v1640_v57, %v714_v6  ;;  %v1678_v5 = vld [vmem:[%s1819_s7] ss:$0 sm:$0xff] }
 0x370   :  { %v733_v28 = vmax.f32 %v695_v24, 0.0  ;;  %v734_v35 = vmax.f32 %v698_v32, 0.0  ;;  %v735_v37 = vmax.f32 %v700_v33, 0.0  ;;  %v736_v42 = vmax.f32 %v703_v41, 0.0 }
 0x371   :  { %v738_v63 = vmax.f32 %v708_v55, 0.0  ;;  %v739_v0 = vmax.f32 %v710_v59, 0.0  ;;  %v740_v34 = vmax.f32 %v713_v43, 0.0  ;;  %v741_v9 = vmax.f32 %v715_v7, 0.0 }
 0x372   :  { %v879_v38 = vpack.c.bf16 %v735_v37, %v734_v35  ;;  %v718_v18 = vadd.f32 %v1640_v57, %v717_v13 }
 0x373   :  { %v881_v4 = vpack.c.bf16 %v739_v0, %v738_v63  ;;  %v882_v11 = vpack.c.bf16 %v741_v9, %v740_v34 }
 0x374   :  { %v742_v58 = vmax.f32 %v718_v18, 0.0 }
 0x376   :  { %v719_v16 = vpop.f32.mrf.mxu1 }
 0x377   :  { %v720_v19 = vadd.f32 %v1640_v57, %v719_v16 }
 0x379   :  { %v743_v62 = vmax.f32 %v720_v19, 0.0 }
 0x37b   :  { %v883_v21 = vpack.c.bf16 %v743_v62, %v742_v58 }
 0x37d   :  { %846 = vmatmul.bf16.gmra.mxu3 %v1490_v61  ;;  %v693_v61 = vadd.f32 %v1640_v57, %v692_v20 }
 0x37e   :  { %v722_v22 = vpop.f32.mrf.mxu1 }
 0x37f   :  { %v732_v23 = vmax.f32 %v693_v61, 0.0 }
 0x381   :  { %v878_v29 = vpack.c.bf16 %v733_v28, %v732_v23 }
 0x383   :  { %945 = vmatmul.bf16.vlgmr.msra.gmra.mxu0 %v878_v29  ;;  %v723_v29 = vadd.f32 %v1640_v57, %v722_v22 }
 0x385   :  { %v744_v33 = vmax.f32 %v723_v29, 0.0 }
 0x386   :  { %v724_v26 = vpop.f32.mrf.mxu1 }
 0x387   :  { %v725_v30 = vadd.f32 %v1640_v57, %v724_v26 }
 0x389   :  { %v745_v35 = vmax.f32 %v725_v30, 0.0 }
 0x38d   :  { %851 = vmatmul.bf16.gmra.mxu3 %v1502_v1  ;;  %v705_v1 = vadd.f32 %v1640_v57, %v704_v40 }
 0x38e   :  { %v727_v40 = vpop.f32.mrf.mxu1 }
 0x38f   :  { %v737_v44 = vmax.f32 %v705_v1, 0.0 }
 0x391   :  { %v880_v46 = vpack.c.bf16 %v737_v44, %v736_v42 }
 0x393   :  { %950 = vmatmul.bf16.gmra.mxu0 %v879_v38  ;;  %v884_v38 = vpack.c.bf16 %v745_v35, %v744_v33 }
 0x396   :  { %v729_v42 = vpop.f32.mrf.mxu1 }
 0x39d   :  { %856 = vmatmul.bf16.gmra.mxu3 %v1508_v3 }
 0x3a3   :  { %955 = vmatmul.bf16.gmra.mxu0 %v880_v46  ;;  %v728_v46 = vadd.f32 %v1640_v57, %v727_v40 }
 0x3b0   :  { %v822_v47 = vpop.f32.mrf.mxu3 }
 0x3b1   :  { %v823_v49 = vadd.f32 %v1640_v57, %v822_v47  ;;  %v730_v47 = vadd.f32 %v1640_v57, %v729_v42 }
 0x3b3   :  { %v862_v60 = vmax.f32 %v823_v49, 0.0  ;;  %960 = vmatmul.bf16.gmra.mxu0 %v881_v4  ;;  %v747_v52 = vmax.f32 %v730_v47, 0.0 }
 0x3b8   :  { %v824_v50 = vpop.f32.mrf.mxu3 }
 0x3b9   :  { %v825_v3 = vadd.f32 %v1640_v57, %v824_v50  ;;  %v746_v50 = vmax.f32 %v728_v46, 0.0 }
 0x3bb   :  { %v863_v25 = vmax.f32 %v825_v3, 0.0  ;;  %v885_v55 = vpack.c.bf16 %v747_v52, %v746_v50 }
 0x3bd   :  { %v1002_v2 = vpack.c.bf16 %v863_v25, %v862_v60 }
 0x3bf   :  { %1018 = vmatmul.bf16.vlgmr.msra.gmra.mxu1 %v1002_v2 }
 0x3c0   :  { %v827_v56 = vpop.f32.mrf.mxu3 }
 0x3c1   :  { %v828_v45 = vadd.f32 %v1640_v57, %v827_v56 }
 0x3c3   :  { %v864_v8 = vmax.f32 %v828_v45, 0.0  ;;  %965 = vmatmul.bf16.gmra.mxu0 %v882_v11 }
 0x3c8   :  { %v829_v53 = vpop.f32.mrf.mxu3 }
 0x3c9   :  { %v830_v36 = vadd.f32 %v1640_v57, %v829_v53 }
 0x3cb   :  { %v865_v27 = vmax.f32 %v830_v36, 0.0 }
 0x3cd   :  { %v1003_v10 = vpack.c.bf16 %v865_v27, %v864_v8 }
 0x3cf   :  { %1023 = vmatmul.bf16.gmra.mxu1 %v1003_v10 }
 0x3d0   :  { %v832_v12 = vpop.f32.mrf.mxu3 }
 0x3d1   :  { %v833_v14 = vadd.f32 %v1640_v57, %v832_v12 }
 0x3d3   :  { %v866_v51 = vmax.f32 %v833_v14, 0.0  ;;  %970 = vmatmul.bf16.gmra.mxu0 %v883_v21 }
 0x3d8   :  { %v834_v15 = vpop.f32.mrf.mxu3 }
 0x3d9   :  { %v835_v17 = vadd.f32 %v1640_v57, %v834_v15 }
 0x3db   :  { %v867_v54 = vmax.f32 %v835_v17, 0.0 }
 0x3dd   :  { %v1004_v20 = vpack.c.bf16 %v867_v54, %v866_v51 }
 0x3df   :  { %1028 = vmatmul.bf16.gmra.mxu1 %v1004_v20 }
 0x3e0   :  { %v837_v61 = vpop.f32.mrf.mxu3 }
 0x3e1   :  { %v838_v23 = vadd.f32 %v1640_v57, %v837_v61 }
 0x3e3   :  { %v868_v31 = vmax.f32 %v838_v23, 0.0  ;;  %975 = vmatmul.bf16.gmra.mxu0 %v884_v38 }
 0x3e8   :  { %v839_v24 = vpop.f32.mrf.mxu3 }
 0x3e9   :  { %v840_v28 = vadd.f32 %v1640_v57, %v839_v24 }
 0x3eb   :  { %v869_v32 = vmax.f32 %v840_v28, 0.0 }
 0x3ed   :  { %v1005_v37 = vpack.c.bf16 %v869_v32, %v868_v31 }
 0x3ef   :  { %1033 = vmatmul.bf16.gmra.mxu1 %v1005_v37 }
 0x3f0   :  { %v842_v39 = vpop.f32.mrf.mxu3 }
 0x3f1   :  { %v843_v41 = vadd.f32 %v1640_v57, %v842_v39 }
 0x3f3   :  { %v870_v48 = vmax.f32 %v843_v41, 0.0  ;;  %980 = vmatmul.bf16.gmra.mxu0 %v885_v55 }
 0x3f8   :  { %v844_v1 = vpop.f32.mrf.mxu3 }
 0x3f9   :  { %v845_v44 = vadd.f32 %v1640_v57, %v844_v1 }
 0x3fb   :  { %v871_v49 = vmax.f32 %v845_v44, 0.0 }
 0x3fd   :  { %v1006_v3 = vpack.c.bf16 %v871_v49, %v870_v48 }
 0x3ff   :  { %1038 = vmatmul.bf16.gmra.mxu1 %v1006_v3 }
 0x400   :  { %v847_v59 = vpop.f32.mrf.mxu3  ;;  %v946_v4 = vpop.f32.mrf.mxu0 }
 0x401   :  { %v848_v60 = vadd.f32 %v1640_v57, %v847_v59  ;;  %v947_v53 = vadd.f32 %v1678_v5, %v946_v4 }
 0x403   :  { %v872_v0 = vmax.f32 %v848_v60, 0.0  ;;  %986 = vst [vmem:[%s1820_s8] sm:$0xff] %v947_v53 }
 0x408   :  { %v849_v25 = vpop.f32.mrf.mxu3  ;;  %v948_v6 = vpop.f32.mrf.mxu0 }
 0x409   :  { %v850_v63 = vadd.f32 %v1640_v57, %v849_v25  ;;  %v949_v36 = vadd.f32 %v1678_v5, %v948_v6 }
 0x40b   :  { %v873_v2 = vmax.f32 %v850_v63, 0.0  ;;  %987 = vst [vmem:[%s1820_s8 + $0x8] sm:$0xff] %v949_v36 }
 0x40d   :  { %v1007_v56 = vpack.c.bf16 %v873_v2, %v872_v0 }
 0x40f   :  { %1043 = vmatmul.bf16.gmra.mxu1 %v1007_v56 }
 0x410   :  { %v852_v45 = vpop.f32.mrf.mxu3  ;;  %v951_v9 = vpop.f32.mrf.mxu0 }
 0x411   :  { %v853_v43 = vadd.f32 %v1640_v57, %v852_v45  ;;  %v952_v13 = vadd.f32 %v1678_v5, %v951_v9 }
 0x413   :  { %v874_v27 = vmax.f32 %v853_v43, 0.0  ;;  %988 = vst [vmem:[%s1820_s8 + $0x10] sm:$0xff] %v952_v13 }
 0x418   :  { %v854_v7 = vpop.f32.mrf.mxu3  ;;  %v953_v12 = vpop.f32.mrf.mxu0 }
 0x419   :  { %v855_v8 = vadd.f32 %v1640_v57, %v854_v7  ;;  %v954_v14 = vadd.f32 %v1678_v5, %v953_v12 }
 0x41b   :  { %v875_v34 = vmax.f32 %v855_v8, 0.0  ;;  %989 = vst [vmem:[%s1820_s8 + $0x18] sm:$0xff] %v954_v14 }
 0x41d   :  { %v1008_v10 = vpack.c.bf16 %v875_v34, %v874_v27 }
 0x41f   :  { %1048 = vmatmul.bf16.gmra.mxu1 %v1008_v10 }
 0x420   :  { %v857_v11 = vpop.f32.mrf.mxu3  ;;  %v956_v51 = vpop.f32.mrf.mxu0 }
 0x421   :  { %v858_v15 = vadd.f32 %v1640_v57, %v857_v11  ;;  %v957_v62 = vadd.f32 %v1678_v5, %v956_v51 }
 0x423   :  { %v876_v18 = vmax.f32 %v858_v15, 0.0  ;;  %990 = vst [vmem:[%s1820_s8 + $0x20] sm:$0xff] %v957_v62 }
 0x428   :  { %v859_v16 = vpop.f32.mrf.mxu3  ;;  %v958_v58 = vpop.f32.mrf.mxu0 }
 0x429   :  { %v860_v17 = vadd.f32 %v1640_v57, %v859_v16  ;;  %v959_v20 = vadd.f32 %v1678_v5, %v958_v58 }
 0x42b   :  { %v877_v19 = vmax.f32 %v860_v17, 0.0  ;;  %991 = vst [vmem:[%s1820_s8 + $0x28] sm:$0xff] %v959_v20 }
 0x42d   :  { %v1009_v54 = vpack.c.bf16 %v877_v19, %v876_v18 }
 0x42f   :  { %1053 = vmatmul.bf16.gmra.mxu1 %v1009_v54 }
 0x430   :  { %v961_v57 = vpop.f32.mrf.mxu0 }
 0x431   :  { %v962_v26 = vadd.f32 %v1678_v5, %v961_v57 }
 0x433   :  { %992 = vst [vmem:[%s1820_s8 + $0x30] sm:$0xff] %v962_v26 }
 0x438   :  { %v963_v23 = vpop.f32.mrf.mxu0 }
 0x439   :  { %v964_v28 = vadd.f32 %v1678_v5, %v963_v23 }
 0x43b   :  { %993 = vst [vmem:[%s1820_s8 + $0x38] sm:$0xff] %v964_v28 }
 0x43c   :  { %v1019_v21 = vpop.f32.mrf.mxu1 }
 0x43d   :  { %v1020_v61 = vadd.f32 %v1678_v5, %v1019_v21 }
 0x43f   :  { %1059 = vst [vmem:[%s1820_s8 + $0x80] sm:$0xff] %v1020_v61 }
 0x440   :  { %v966_v30 = vpop.f32.mrf.mxu0 }
 0x441   :  { %v967_v37 = vadd.f32 %v1678_v5, %v966_v30 }
 0x443   :  { %994 = vst [vmem:[%s1820_s8 + $0x40] sm:$0xff] %v967_v37 }
 0x444   :  { %v1021_v22 = vpop.f32.mrf.mxu1 }
 0x445   :  { %v1022_v24 = vadd.f32 %v1678_v5, %v1021_v22 }
 0x447   :  { %1060 = vst [vmem:[%s1820_s8 + $0x88] sm:$0xff] %v1022_v24 }
 0x448   :  { %v968_v33 = vpop.f32.mrf.mxu0 }
 0x449   :  { %v969_v38 = vadd.f32 %v1678_v5, %v968_v33 }
 0x44b   :  { %995 = vst [vmem:[%s1820_s8 + $0x48] sm:$0xff] %v969_v38 }
 0x44c   :  { %v1024_v29 = vpop.f32.mrf.mxu1 }
 0x44d   :  { %v1025_v31 = vadd.f32 %v1678_v5, %v1024_v29 }
 0x44f   :  { %1061 = vst [vmem:[%s1820_s8 + $0x90] sm:$0xff] %v1025_v31 }
 0x450   :  { %v971_v40 = vpop.f32.mrf.mxu0 }
 0x451   :  { %v972_v46 = vadd.f32 %v1678_v5, %v971_v40 }
 0x453   :  { %996 = vst [vmem:[%s1820_s8 + $0x50] sm:$0xff] %v972_v46 }
 0x454   :  { %v1026_v32 = vpop.f32.mrf.mxu1 }
 0x455   :  { %v1027_v35 = vadd.f32 %v1678_v5, %v1026_v32 }
 0x457   :  { %1062 = vst [vmem:[%s1820_s8 + $0x98] sm:$0xff] %v1027_v35 }
 0x458   :  { %v973_v42 = vpop.f32.mrf.mxu0 }
 0x459   :  { %v974_v47 = vadd.f32 %v1678_v5, %v973_v42 }
 0x45b   :  { %997 = vst [vmem:[%s1820_s8 + $0x58] sm:$0xff] %v974_v47 }
 0x45c   :  { %v1029_v39 = vpop.f32.mrf.mxu1 }
 0x45d   :  { %v1030_v41 = vadd.f32 %v1678_v5, %v1029_v39 }
 0x45f   :  { %1063 = vst [vmem:[%s1820_s8 + $0xa0] sm:$0xff] %v1030_v41 }
 0x460   :  { %v976_v49 = vpop.f32.mrf.mxu0 }
 0x461   :  { %v977_v59 = vadd.f32 %v1678_v5, %v976_v49 }
 0x463   :  { %998 = vst [vmem:[%s1820_s8 + $0x60] sm:$0xff] %v977_v59 }
 0x464   :  { %v1031_v1 = vpop.f32.mrf.mxu1 }
 0x465   :  { %v1032_v44 = vadd.f32 %v1678_v5, %v1031_v1 }
 0x467   :  { %1064 = vst [vmem:[%s1820_s8 + $0xa8] sm:$0xff] %v1032_v44 }
 0x468   :  { %v978_v3 = vpop.f32.mrf.mxu0 }
 0x469   :  { %v979_v60 = vadd.f32 %v1678_v5, %v978_v3 }
 0x46b   :  { %999 = vst [vmem:[%s1820_s8 + $0x68] sm:$0xff] %v979_v60 }
 0x46c   :  { %v1034_v48 = vpop.f32.mrf.mxu1 }
 0x46d   :  { %v1035_v50 = vadd.f32 %v1678_v5, %v1034_v48 }
 0x46f   :  { %1065 = vst [vmem:[%s1820_s8 + $0xb0] sm:$0xff] %v1035_v50 }
 0x470   :  { %v981_v63 = vpop.f32.mrf.mxu0 }
 0x471   :  { %v982_v45 = vadd.f32 %v1678_v5, %v981_v63 }
 0x473   :  { %1000 = vst [vmem:[%s1820_s8 + $0x70] sm:$0xff] %v982_v45 }
 0x474   :  { %v1036_v52 = vpop.f32.mrf.mxu1 }
 0x475   :  { %v1037_v55 = vadd.f32 %v1678_v5, %v1036_v52 }
 0x477   :  { %1066 = vst [vmem:[%s1820_s8 + $0xb8] sm:$0xff] %v1037_v55 }
 0x478   :  { %v983_v4 = vpop.f32.mrf.mxu0 }
 0x479   :  { %v984_v53 = vadd.f32 %v1678_v5, %v983_v4 }
 0x47b   :  { %1001 = vst [vmem:[%s1820_s8 + $0x78] sm:$0xff] %v984_v53 }
 0x47c   :  { %v1039_v25 = vpop.f32.mrf.mxu1 }
 0x47d   :  { %v1040_v0 = vadd.f32 %v1678_v5, %v1039_v25 }
 0x47f   :  { %1067 = vst [vmem:[%s1820_s8 + $0xc0] sm:$0xff] %v1040_v0 }
 0x484   :  { %v1041_v2 = vpop.f32.mrf.mxu1 }
 0x485   :  { %v1042_v56 = vadd.f32 %v1678_v5, %v1041_v2 }
 0x487   :  { %1068 = vst [vmem:[%s1820_s8 + $0xc8] sm:$0xff] %v1042_v56 }
 0x48c   :  { %v1044_v6 = vpop.f32.mrf.mxu1 }
 0x48d   :  { %v1045_v36 = vadd.f32 %v1678_v5, %v1044_v6 }
 0x48f   :  { %1069 = vst [vmem:[%s1820_s8 + $0xd0] sm:$0xff] %v1045_v36 }
 0x494   :  { %v1046_v43 = vpop.f32.mrf.mxu1 }
 0x495   :  { %v1047_v7 = vadd.f32 %v1678_v5, %v1046_v43 }
 0x497   :  { %1070 = vst [vmem:[%s1820_s8 + $0xd8] sm:$0xff] %v1047_v7 }
 0x49c   :  { %v1049_v8 = vpop.f32.mrf.mxu1 }
 0x49d   :  { %v1050_v27 = vadd.f32 %v1678_v5, %v1049_v8 }
 0x49f   :  { %1071 = vst [vmem:[%s1820_s8 + $0xe0] sm:$0xff] %v1050_v27 }
 0x4a4   :  { %v1051_v34 = vpop.f32.mrf.mxu1 }
 0x4a5   :  { %v1052_v9 = vadd.f32 %v1678_v5, %v1051_v34 }
 0x4a7   :  { %1072 = vst [vmem:[%s1820_s8 + $0xe8] sm:$0xff] %v1052_v9 }
 0x4ac   :  { %v1054_v10 = vpop.f32.mrf.mxu1 }
 0x4ad   :  { %v1055_v11 = vadd.f32 %v1678_v5, %v1054_v10 }
 0x4af   :  { %1073 = vst [vmem:[%s1820_s8 + $0xf0] sm:$0xff] %v1055_v11 }
 0x4b4   :  { %v1056_v12 = vpop.f32.mrf.mxu1 }
 0x4b5   :  { %v1057_v13 = vadd.f32 %v1678_v5, %v1056_v12 }
 0x4b7   :  { %1074 = vst [vmem:[%s1820_s8 + $0xf8] sm:$0xff] %v1057_v13 }

</bundles_post_ra>
